<compile_context>
chip_gen: v7x
topology: tpu7x:2x2x1
jax: 0.10.0
libtpu: 0.0.40
codegen_flags: <defaults>
</compile_context>

<pallas_src>
import jax
import jax.numpy as jnp
from jax.experimental import pallas as pl
from jax.experimental.pallas import tpu as pltpu


# ----------------------------- Pallas kernel -----------------------------

def _embedding_kernel(x_ref, w_ref, bias_ref, o_ref):
    """Fused 1x1 conv (BN scale pre-folded into W) -> +bias -> ReLU.

    x_ref:    (1, Cin, Ts)   one batch element, Ts flattened-spatial lanes
    w_ref:    (Cout, Cin)    conv weight with BN scale folded in
    bias_ref: (Cout, 1)      folded bias  (beta + scale*(conv_b - mean))
    o_ref:    (1, Cout, Ts)
    """
    # 1x1 conv == channel matmul on the MXU; spatial stays on the lane axis.
    y = jnp.dot(w_ref[...], x_ref[0], preferred_element_type=jnp.float32)
    y = y + bias_ref[...]                         # folded conv-bias + BN shift
    o_ref[0] = jnp.maximum(y, 0.0).astype(o_ref.dtype)


# ----------------------------- tiling helpers -----------------------------

def _round_up(x, m):
    return -(-x // m) * m


def _vmem_capacity_bytes():
    try:
        return int(pltpu.get_tpu_info().vmem_capacity_bytes)
    except Exception:
        return 64 << 20          # conservative: v7x has 64 MiB per TensorCore


def _pick_spatial_tile(hw, n, cin, cout, x_bytes, out_bytes, budget_bytes):
    """Largest lane tile (multiple of 256, else 128) fitting the VMEM budget."""
    per_lane = 2 * cin * x_bytes + 2 * cout * out_bytes   # double-buffered x/out
    fixed = 2 * cout * cin * x_bytes + cout * 128 * 4     # W (2 bufs) + padded bias
    avail = max(budget_bytes - fixed, 128 * per_lane)
    ts = max(int(avail // per_lane), 128)
    ts = (ts // 256) * 256 if ts >= 256 else 128   # 256-mult: v6e/v7x MXU columns
    ts = min(ts, 4096)                             # step overhead fully amortized
    ts = min(ts, _round_up(hw, 128))               # never exceed padded extent
    # v7x megacore: keep at least two parallel grid steps when possible.
    if n * pl.cdiv(hw, ts) < 2 and _round_up(hw, 128) >= 256:
        ts = _round_up(pl.cdiv(hw, 2), 128)
    return ts


# ----------------------------- forward wrapper -----------------------------

def embedding_forward(features_nchw, w, scale, bias, *,
                      compute_dtype=None, spatial_tile=None):
    """Embedding.forward: relu(BN(conv1x1(features))).  NCHW in, NCHW out.

    `scale`/`bias` are the folded eval-mode BN terms (see fold_bn); the scale
    is folded into the weight here so the kernel epilogue is only +bias, ReLU.
    """
    N, Cin, H, W = features_nchw.shape
    Cout = w.shape[0]
    HW = H * W
    out_dtype = features_nchw.dtype

    # Fold BN scale into the 1x1 conv weight: one-time (Cout, Cin) op.
    w_eff = w.astype(jnp.float32) * scale.astype(jnp.float32)[:, None]
    x = features_nchw.reshape(N, Cin, HW)          # contiguous reshape
    if compute_dtype is not None:                  # e.g. bf16 operands (v6e/v7x)
        x = x.astype(compute_dtype)
        w_eff = w_eff.astype(compute_dtype)

    xb = jnp.dtype(x.dtype).itemsize
    ob = jnp.dtype(out_dtype).itemsize

    cap = _vmem_capacity_bytes()
    budget = min(cap // 3, 24 << 20)               # buffer budget w/ headroom
    if spatial_tile is None:
        spatial_tile = _pick_spatial_tile(HW, N, Cin, Cout, xb, ob, budget)

    # Pad the flattened spatial axis to a whole number of lane-dense tiles so
    # every store is an unmasked vst; padded columns are sliced off below.
    HW_pad = _round_up(HW, spatial_tile)
    if HW_pad != HW:
        x = jnp.pad(x, ((0, 0), (0, 0), (0, HW_pad - HW)))
    n_tiles = HW_pad // spatial_tile

    cost = pl.CostEstimate(
        flops=2 * N * Cout * Cin * HW_pad,
        transcendentals=0,
        bytes_accessed=(N * Cin * HW_pad * xb + N * Cout * HW_pad * ob
                        + Cout * Cin * xb + Cout * 4),
    )

    out = pl.pallas_call(
        _embedding_kernel,
        out_shape=jax.ShapeDtypeStruct((N, Cout, HW_pad), out_dtype),
        grid_spec=pltpu.PrefetchScalarGridSpec(
            num_scalar_prefetch=0,
            grid=(N, n_tiles),
            in_specs=[
                pl.BlockSpec((1, Cin, spatial_tile), lambda n, s: (n, 0, s)),
                pl.BlockSpec((Cout, Cin), lambda n, s: (0, 0)),
                pl.BlockSpec((Cout, 1), lambda n, s: (0, 0)),
            ],
            out_specs=pl.BlockSpec((1, Cout, spatial_tile),
                                   lambda n, s: (n, 0, s)),
        ),
        compiler_params=pltpu.CompilerParams(
            dimension_semantics=("parallel", "parallel"),
            vmem_limit_bytes=int(min(cap // 2, 48 << 20)),
        ),
        cost_estimate=cost,
    )(x, w_eff, bias.astype(jnp.float32).reshape(Cout, 1))

    if HW_pad != HW:
        out = out[:, :, :HW]
    return out.reshape(N, Cout, H, W)


# ----------------------------- parameters -----------------------------

def init_embedding_params(key, input_dim, out_dim, use_conv_bias=False):
    """Deterministic init mimicking Conv2d(1x1) + BatchNorm2d (eval mode)."""
    kw, kb, kg, kbe, km, kv = jax.random.split(key, 6)
    w = jax.random.normal(kw, (out_dim, input_dim), jnp.float32) * \
        (2.0 / input_dim) ** 0.5                       # kaiming-ish
    conv_b = (0.1 * jax.random.normal(kb, (out_dim,), jnp.float32)
              if use_conv_bias else jnp.zeros((out_dim,), jnp.float32))
    gamma = 1.0 + 0.02 * jax.random.normal(kg, (out_dim,), jnp.float32)
    beta = 0.1 * jax.random.normal(kbe, (out_dim,), jnp.float32)
    running_mean = 0.1 * jax.random.normal(km, (out_dim,), jnp.float32)
    running_var = jnp.abs(1.0 + 0.1 * jax.random.normal(kv, (out_dim,),
                                                        jnp.float32))
    return {
        "w": w, "conv_b": conv_b, "gamma": gamma, "beta": beta,
        "mean": running_mean, "var": running_var, "eps": 1e-5,
    }


def fold_bn(params):
    """Fold conv bias + eval-mode BN into one per-channel scale & bias."""
    scale = params["gamma"] / jnp.sqrt(params["var"] + params["eps"])
    bias = params["beta"] + scale * (params["conv_b"] - params["mean"])
    return scale, bias


# ---------- pure-JAX reference (for correctness checking) ----------

def _ref_forward(params, x_nchw):
    y = jnp.einsum("oi,nihw->nohw", params["w"], x_nchw)
    y = y + params["conv_b"][None, :, None, None]
    scale = params["gamma"] / jnp.sqrt(params["var"] + params["eps"])
    y = (y - params["mean"][None, :, None, None]) * scale[None, :, None, None] \
        + params["beta"][None, :, None, None]
    return jnp.maximum(y, 0.0)


if __name__ == "__main__":
    key = jax.random.PRNGKey(0)
    kp, kx, kx2 = jax.random.split(key, 3)

    N, input_dim, out_dim = 2, 32, 16
    params = init_embedding_params(kp, input_dim, out_dim, use_conv_bias=False)
    scale, bias = fold_bn(params)

    # Case 1: HW already a multiple of 128 (16x16 = 256 lanes).
    features = jax.random.normal(kx, (N, input_dim, 16, 16), jnp.float32)
    out = jax.block_until_ready(
        embedding_forward(features, params["w"], scale, bias))
    ref = jax.block_until_ready(_ref_forward(params, features))
    assert out.shape == (N, out_dim, 16, 16), out.shape
    assert jnp.allclose(out, ref, atol=1e-3, rtol=1e-3), "mismatch (16x16)"

    # Case 2: ResNet-style HW not a multiple of 128 (7x7 = 49) -> pad path.
    features2 = jax.random.normal(kx2, (N, input_dim, 7, 7), jnp.float32)
    out2 = jax.block_until_ready(
        embedding_forward(features2, params["w"], scale, bias))
    ref2 = jax.block_until_ready(_ref_forward(params, features2))
    assert out2.shape == (N, out_dim, 7, 7), out2.shape
    assert jnp.allclose(out2, ref2, atol=1e-3, rtol=1e-3), "mismatch (7x7)"

    print("KERNEL_OK")
</pallas_src>

<mosaic_0001>
module attributes {stable_mosaic.version = 11 : i64} {
  func.func @_embedding_kernel(%arg0: i32, %arg1: i32, %arg2: memref<1x32x256xf32, #tpu.memory_space<vmem>>, %arg3: memref<16x32xf32, #tpu.memory_space<vmem>>, %arg4: memref<16x1xf32, #tpu.memory_space<vmem>>, %arg5: memref<1x16x256xf32, #tpu.memory_space<vmem>>) attributes {dimension_semantics = [#tpu.dimension_semantics<parallel>, #tpu.dimension_semantics<parallel>], iteration_bounds = array<i64: 2, 1>, scalar_prefetch = 0 : i64, scratch_operands = 0 : i64, tpu.core_type = #tpu.core_type<tc>, window_params = [{transform_indices = @transform_0, window_bounds = array<i64: 1, 32, 256>}, {pipeline_mode = #tpu.pipeline_mode<synchronous>, transform_indices = @transform_1, window_bounds = array<i64: 16, 32>}, {pipeline_mode = #tpu.pipeline_mode<synchronous>, transform_indices = @transform_2, window_bounds = array<i64: 16, 1>}, {transform_indices = @transform_3, window_bounds = array<i64: 1, 16, 256>}]} {
    %c0 = arith.constant 0 : index
    %c0_0 = arith.constant 0 : index
    %0 = vector.load %arg3[%c0, %c0_0] : memref<16x32xf32, #tpu.memory_space<vmem>>, vector<16x32xf32>
    %c0_1 = arith.constant 0 : index
    %c0_2 = arith.constant 0 : index
    %c0_3 = arith.constant 0 : index
    %1 = vector.load %arg2[%c0_1, %c0_2, %c0_3] : memref<1x32x256xf32, #tpu.memory_space<vmem>>, vector<1x32x256xf32>
    %2 = vector.shape_cast %1 : vector<1x32x256xf32> to vector<32x256xf32>
    %cst = arith.constant dense<0.000000e+00> : vector<16x256xf32>
    %3 = tpu.matmul %0, %2, %cst {dimension_numbers = #tpu.dot_dimension_numbers<[1], [0], [0], [1], [0, 0, 1, 1], [], []>} : vector<16x32xf32>, vector<32x256xf32>, vector<16x256xf32> -> vector<16x256xf32>
    %c0_4 = arith.constant 0 : index
    %c0_5 = arith.constant 0 : index
    %4 = vector.load %arg4[%c0_4, %c0_5] : memref<16x1xf32, #tpu.memory_space<vmem>>, vector<16x1xf32>
    %5 = vector.broadcast %4 : vector<16x1xf32> to vector<16x256xf32>
    %6 = arith.addf %3, %5 : vector<16x256xf32>
    %cst_6 = arith.constant 0.000000e+00 : f32
    %7 = vector.broadcast %cst_6 : f32 to vector<16x256xf32>
    %8 = arith.maximumf %6, %7 : vector<16x256xf32>
    %c0_7 = arith.constant 0 : index
    %c0_8 = arith.constant 0 : index
    %c0_9 = arith.constant 0 : index
    %9 = vector.load %arg5[%c0_7, %c0_8, %c0_9] : memref<1x16x256xf32, #tpu.memory_space<vmem>>, vector<1x16x256xf32>
    %10 = vector.shape_cast %9 : vector<1x16x256xf32> to vector<16x256xf32>
    %11 = vector.shape_cast %8 : vector<16x256xf32> to vector<1x16x256xf32>
    tpu.vector_store %arg5[%c0_7, %c0_8, %c0_9], %11 {strides = array<i32>} : memref<1x16x256xf32, #tpu.memory_space<vmem>>, vector<1x16x256xf32>,
    return
  }
  func.func @transform_0(%arg0: i32, %arg1: i32) -> (i32, i32, i32) {
    %c0_i32 = arith.constant 0 : i32
    %c0_i32_0 = arith.constant 0 : i32
    return %arg0, %c0_i32, %arg1 : i32, i32, i32
  }
  func.func @transform_1(%arg0: i32, %arg1: i32) -> (i32, i32) {
    %c0_i32 = arith.constant 0 : i32
    %c0_i32_0 = arith.constant 0 : i32
    %c0_i32_1 = arith.constant 0 : i32
    return %c0_i32, %c0_i32_0 : i32, i32
  }
  func.func @transform_2(%arg0: i32, %arg1: i32) -> (i32, i32) {
    %c0_i32 = arith.constant 0 : i32
    %c0_i32_0 = arith.constant 0 : i32
    %c0_i32_1 = arith.constant 0 : i32
    return %c0_i32, %c0_i32_0 : i32, i32
  }
  func.func @transform_3(%arg0: i32, %arg1: i32) -> (i32, i32, i32) {
    %c0_i32 = arith.constant 0 : i32
    %c0_i32_0 = arith.constant 0 : i32
    return %arg0, %c0_i32, %arg1 : i32, i32, i32
  }
}

</mosaic_0001>

<bundles_post_ra>
// kernel: tpu_custom_call.1
= control target key start
LH: loop header
LB: loop body
LE: loop exit
PB: predicated region body
PF: predicated region fallthrough
CT: control target
= control target key end

     0   :  { %8 = vsyncpa [#allocation3], 0  ;;  %s856_s0 = inlined_call_operand.hbm [shape: f32[2,32,256], index: 0, kind: input, shape index: {}]   ;;  %s857_s1 = inlined_call_operand.vmem [shape: f32[16,32], index: 1, kind: input, shape index: {}]   ;;  %s858_s2 = inlined_call_operand.vmem [shape: f32[16,1], index: 2, kind: input, shape index: {}]   ;;  %s859_s3 = inlined_call_operand.hbm [shape: f32[2,16,256], index: 3, kind: output, shape index: {}]  }
   0x1   :  { %10 = vsyncpa [#allocation3 + $0x1], 0 }
   0x2   :  { %11 = vsyncpa [#allocation4], 0 }
   0x3   :  { %13 = vsyncpa [#allocation4 + $0x1], 0  ;;  %s668_s12 = smov 0   ;;  %s670_s13 = smov 0  }
   0x4   :  { %s672_s14 = smov 0   ;;  %s674_s15 = smov 0  }
   0x5   :  { %s676_s16 = smov 0   ;;  %s678_s17 = smov 0  }
   0x6 LB: > { %s426_s18 = sadd.s32 4294967295, %s638_s17   ;;  %s427_s19 = sadd.s32 4294967294, %s638_s17   ;;  %s638_s17 = sphi %s678_s17, %s19_s17   ;;  %s634_s16 = sphi %s676_s16, %s874_s16   ;;  %s630_s15 = sphi %s674_s15, %s873_s15   ;;  %s626_s14 = sphi %s672_s14, %s872_s14   ;;  %s622_s13 = sphi %s670_s13, %s871_s13   ;;  %s618_s12 = sphi %s668_s12, %s870_s12  }
   0x7   : > { %s31_s20 = sadd.s32 1, %s634_s16  ;;  %s40_s21 = sadd.s32 1, %s626_s14 }
   0x8   : > { %p33_p0 = scmp.ge.s32.totalorder %s31_s20, 2  ;;  %p47_p1 = scmp.ne.s32.totalorder %s626_s14, %s622_s13 }
   0x9   : > { %p48_p2 = scmp.eq.s32.totalorder %s638_s17, 0  ;;  %p53_p3 = scmp.ne.s32.totalorder %s622_s13, %s618_s12 }
   0xa   : > { %s876_s20 = smov (%p33_p0, %s31_s20), 0  ;;  %p54_p5 = scmp.eq.s32.totalorder %s426_s18, 0 }
   0xb   : > { %p709_p4 = por %p48_p2, %p47_p1  ;;  %s35_s23 = ssub.s32 %s634_s16, %s876_s20 }
   0xc   : > { %p121_p6 = scmp.eq.s32.totalorder %s426_s18, 1  ;;  %p38_p7 = scmp.eq.s32.totalorder %s35_s23, 0 }
   0xd   : > { %p715_p8 = por %p54_p5, %p53_p3  ;;  %p127_p10 = scmp.eq.s32.totalorder %s427_s19, 1 }
   0xe   : > { %p719_p9 = por %p121_p6, %p47_p1  ;;  %p469_p13 = scmp.lt.s32.totalorder %s638_s17, 2 }
   0xf   : > { %s724_s26 = scalar_select %p38_p7, %s626_s14, %s40_s21  }
  0x10   : > { %s863_s25 = scalar_select %p719_p9, 1, 0 }
  0x11   : > { %p726_p11 = por %p127_p10, %p53_p3  ;;  %s153_s28 = sand.u32 1, %s626_s14  }
  0x12   : > { %s430_s29 = sshll.u32 %s153_s28, 6  ;;  %s443_s30 = sshll.u32 %s634_s16, 10 }
  0x13   : > { %s864_s27 = scalar_select %p726_p11, 1, 0 }
  0x14   : > { %s737_s6 = scalar_lea.hbm %s856_s0, %s443_s30  ;;  %s157_s7 = scalar_lea.vmem [#allocation2], %s430_s29 }
  0x15   : > { %s166_s8 = sshll.u32 %s157_s7, 4  ;;  %p743_p0 = pnand %p469_p13, %p709_p4  ;;  %s739_s8 = int_to_ptr.vmem [resolvable:$true] %s166_s8 }
  0x16   : > { %s748_s10 = scalar_lea.sflag [#allocation3], %s153_s28  ;;  %s526_s11 = scalar_lea.hbm %s737_s6, 1024 }
  0x17   : > { %p527_p2 = scmp.ne.s32.totalorder %s737_s6, %s526_s11  ;;  %p528_p3 = pneg %p743_p0 }
  0x18   : > { %s531_s21 = scalar_lea.hbm %s856_s0, 2048  ;;  %p532_p4 = scmp.lt.u32.totalorder %s737_s6, %s856_s0 }
  0x19   : > { %p529_p5 = pnand %p528_p3, %p527_p2  ;;  %p533_p7 = scmp.lt.u32.totalorder %s531_s21, %s526_s11 }
  0x1a   : > { %p535_p13 = scmp.lt.u32.totalorder %s526_s11, %s737_s6 }
  0x1b   : > { %p530_p6 = pneg %p529_p5  ;;  %p534_p10 = por %p533_p7, %p532_p4 }
  0x1d   : > { %p536_p12 = por %p535_p13, %p534_p10 }
  0x1f   : > { %p537_p1 = pnand %p536_p12, %p530_p6 }
  0x21   : > { %540 = shalt.err (!%p537_p1)
}
  0x22   : > { %s541_s28 = scalar_lea.vmem %s739_s8, 1024  ;;  %s640_s29 = smov [#allocation2]  }
  0x23   : > { %p542_p2 = scmp.ne.s32.totalorder %s739_s8, %s541_s28  ;;  %s546_s30 = sshll.u32 %s640_s29, 4  ;;  %s547_s30 = int_to_ptr.vmem [resolvable:$false] %s546_s30 }
  0x24   : > { %s548_s4 = scalar_lea.vmem %s547_s30, 2048  ;;  %p549_p9 = scmp.lt.s32.totalorder %s739_s8, %s547_s30 }
  0x25   : > { %p544_p5 = pnand %p542_p2, %p528_p3  ;;  %p550_p4 = scmp.lt.s32.totalorder %s548_s4, %s541_s28 }
  0x27   : > { %p545_p11 = pneg %p544_p5  ;;  %p551_p7 = por %p550_p4, %p549_p9 }
  0x29   : > { %p552_p10 = pnand %p551_p7, %p545_p11 }
  0x2b   : > { %555 = shalt.err (!%p552_p10)
}
  0x2c   : > { %s641_s5 = smov 256   ;;  %s642_s7 = smov 16  }
  0x2d   : > { %464 = dma.hbm_to_vmem [thread:$0]  (!%p743_p0), %s737_s6, 1024, %s739_s8, %s748_s10, %s641_s5, %s641_s5, %s642_s7  }
  0x2e   : > { %p174_p12 = scmp.lt.s32.totalorder %s638_s17, 3  ;;  %p866_p1 = scmp.ge.s32.totalorder %s638_s17, 1 }
  0x30   : > { %p175_p3 = pnand %p866_p1, %p174_p12 }
  0x31   : > { %s780_s11 = sand.u32 (!%p175_p3), 1, %s622_s13  }
  0x32   : > { %178 = sbr.rel (%p175_p3) target bundleno = 301 (0x12d), region = 32  ;;  %s434_s18 = sshll.u32 (!%p175_p3), %s780_s11, 6 }
  0x33   : > { %s181_s19 = scalar_lea.sflag (!%p175_p3), [#allocation3], %s780_s11  ;;  %s184_s21 = scalar_lea.vmem (!%p175_p3), [#allocation2], %s434_s18 }
  0x39   : > { %609 = dma.done.wait (%p715_p8), %s181_s19, 1024  }
  0x3a   : > { %611 = vsyncadd (%p715_p8), %s181_s19, 4294966272  ;;  %v643_v0 = vmov 0.0   ;;  %v644_v1 = vmov 0   ;;  %v212_v2 = vld [vmem:[%s184_s21 + $0x8] sm:$0xff]  ;;  %v214_v3 = vld [vmem:[%s184_s21 + $0x18] sm:$0xff]  ;;  %vm231_vm0 = vcmask 261120  }
  0x3b   : > { %302 = vmatprep.mubr.f32.mxu0 %v643_v0  ;;  %308 = vmatprep.mubr.f32.mxu1 %v643_v0  ;;  %v211_v4 = vld [vmem:[%s184_s21] sm:$0xff]  ;;  %v445_v5 = vpack.c.bf16 %v214_v3, %v212_v2  ;;  %v213_v6 = vld [vmem:[%s184_s21 + $0x10] sm:$0xff]  ;;  %v216_v7 = vld [vmem:[%s184_s21 + $0x28] sm:$0xff]  ;;  %s435_s29 = sshll.u32 %s780_s11, 5  ;;  %s444_s5 = sshll.u32 %s630_s15, 9 }
  0x3c   : > { %525 = vset.pattern.permute.xlu0 %v644_v1  ;;  %v218_v8 = vld [vmem:[%s184_s21 + $0x38] sm:$0xff]  ;;  %v447_v9 = vpack.c.bf16 %v213_v6, %v211_v4  ;;  %v215_v11 = vld [vmem:[%s184_s21 + $0x20] sm:$0xff]  ;;  %v217_v12 = vld [vmem:[%s184_s21 + $0x30] sm:$0xff]  ;;  %s206_s30 = scalar_lea.vmem [#allocation5], %s435_s29  ;;  %s807_s19 = scalar_lea.hbm %s859_s3, %s444_s5 }
  0x3d   : > { %v449_v10 = vpack.c.bf16 %v218_v8, %v216_v7  ;;  %446 = vmatprep.subr.bf16.mxu0 %v445_v5  ;;  %453 = vmatprep.subr.bf16.mxu1 %v445_v5  ;;  %v219_v13 = vld [vmem:[%s858_s2] sm:$0xff]  ;;  %v451_v14 = vpack.c.bf16 %v217_v12, %v215_v11  ;;  %v220_v15 = vld [vmem:[%s858_s2 + $0x8] sm:$0xff]  ;;  %s339_s4 = sshll.u32 %s206_s30, 4  ;;  %s324_s15 = scalar_lea.sflag [#allocation4], %s780_s11  ;;  %s802_s4 = int_to_ptr.vmem [resolvable:$true] %s339_s4 }
  0x3e   : > { %448 = vmatpush1.bf16.msra.mxu0 %v447_v9  ;;  %455 = vmatpush1.bf16.msra.mxu1 %v447_v9  ;;  %v209_v16 = vld [vmem:[%s857_s1] sm:$0xff]  ;;  %v210_v17 = vld [vmem:[%s857_s1 + $0x8] sm:$0xff]  ;;  %s556_s21 = scalar_lea.vmem %s802_s4, 512  ;;  %p867_p9 = scmp.ne.s32.totalorder %s863_s25, 0 }
  0x3f   : > { %450 = vmatprep.subr.bf16.mxu0 %v449_v10  ;;  %454 = vmatprep.subr.bf16.mxu1 %v449_v10  ;;  %p557_p8 = scmp.ne.s32.totalorder %s802_s4, %s556_s21  ;;  %s645_s24 = smov [#allocation5]  }
  0x40   : > { %223 = vperm.xlu0 %525, %v219_v13   ;;  %s560_s6 = sshll.u32 %s645_s24, 4  ;;  %s561_s6 = int_to_ptr.vmem [resolvable:$false] %s560_s6 }
  0x41   : > { %p558_p11 = pnand %p557_p8, %p867_p9  ;;  %s562_s8 = scalar_lea.vmem %s561_s6, 1024 }
  0x42   : > { %452 = vmatpush1.bf16.msra.mxu0 %v451_v14  ;;  %456 = vmatpush1.bf16.msra.mxu1 %v451_v14  ;;  %p563_p6 = scmp.lt.s32.totalorder %s802_s4, %s561_s6  ;;  %p564_p13 = scmp.lt.s32.totalorder %s562_s8, %s556_s21 }
  0x43   : > { %p559_p0 = pneg %p558_p11 }
  0x44   : > { %228 = vperm.xlu0 %525, %v220_v15   ;;  %p565_p2 = por %p564_p13, %p563_p6 }
  0x45   : > { %436 = vmatmul.mubr.msk.f32.vlgmr.msra.gmra.mrb[0].mxu0 %vm231_vm0, %v209_v16  ;;  %437 = vmatmul.mubr.msk.f32.vlgmr.msra.gmra.mrb[0].mxu1 %vm231_vm0, %v210_v17 }
  0x46   : > { %p566_p5 = pnand %p565_p2, %p559_p0 }
  0xbf   : > { %v224_v18 = vpop.permute.xlu0 %223 }
  0xc3   : > { %v229_v19 = vpop.permute.xlu0 %228 }
 0x118   : > { %v304_v20 = vpop.f32.mrb[0].mxu0  ;;  %v310_v21 = vpop.f32.mrb[0].mxu1 }
 0x119   : > { %v305_v22 = vadd.f32 %v304_v20, %v224_v18  ;;  %v311_v23 = vadd.f32 %v310_v21, %v229_v19  ;;  %v306_v24 = vpop.f32.mrb[1].mxu0  ;;  %v312_v25 = vpop.f32.mrb[1].mxu1 }
 0x11a   : > { %v307_v26 = vadd.f32 %v306_v24, %v224_v18  ;;  %v313_v27 = vadd.f32 %v312_v25, %v229_v19 }
 0x11b   : > { %v315_v28 = vmax.f32 %v305_v22, 0.0  ;;  %v317_v29 = vmax.f32 %v311_v23, 0.0 }
 0x11c   : > { %v316_v30 = vmax.f32 %v307_v26, 0.0  ;;  %v318_v31 = vmax.f32 %v313_v27, 0.0 }
 0x11d   : > { %319 = vst [vmem:[%s206_s30] sm:$0xff] %v315_v28  ;;  %321 = vst [vmem:[%s206_s30 + $0x10] sm:$0xff] %v317_v29 }
 0x11e   : > { %320 = vst [vmem:[%s206_s30 + $0x8] sm:$0xff] %v316_v30  ;;  %322 = vst [vmem:[%s206_s30 + $0x18] sm:$0xff] %v318_v31 }
 0x11f   : > { %569 = shalt.err (!%p566_p5)
}
 0x120   : > { %s570_s9 = scalar_lea.hbm %s807_s19, 512  ;;  %s574_s23 = scalar_lea.hbm %s859_s3, 1024 }
 0x121   : > { %p571_p4 = scmp.ne.s32.totalorder %s807_s19, %s570_s9  ;;  %p575_p12 = scmp.lt.u32.totalorder %s807_s19, %s859_s3 }
 0x122   : > { %p576_p1 = scmp.lt.u32.totalorder %s574_s23, %s570_s9  ;;  %p578_p8 = scmp.lt.u32.totalorder %s570_s9, %s807_s19 }
 0x123   : > { %p572_p7 = pnand %p571_p4, %p867_p9 }
 0x124   : > { %p577_p3 = por %p576_p1, %p575_p12 }
 0x125   : > { %p573_p10 = pneg %p572_p7 }
 0x126   : > { %p579_p11 = por %p578_p8, %p577_p3 }
 0x128   : > { %p580_p0 = pnand %p579_p11, %p573_p10 }
 0x12a   : > { %583 = shalt.err (!%p580_p0)
}
 0x12b   : > { %s646_s30 = smov 256   ;;  %s647_s5 = smov 16  }
 0x12c   : > { %459 = dma.vmem_to_hbm [thread:$0]  (%p867_p9), %s802_s4, 512, %s807_s19, %s324_s15, %s646_s30, %s646_s30, %s647_s5  }
 0x12d PF: > { %s354_s7 = sand.u32 1, %s618_s12   ;;  %p868_p6 = scmp.ne.s32.totalorder %s864_s27, 0 }
 0x12e   : > { %p869_p13 = scmp.ge.s32.totalorder %s638_s17, 2  ;;  %s355_s18 = scalar_lea.sflag [#allocation4], %s354_s7 }
 0x130   : > { %p466_p2 = pnand %p869_p13, %p868_p6 }
 0x132   : > { %613 = dma.done.wait (!%p466_p2), %s355_s18, 512  }
 0x133   : > { %615 = vsyncadd (!%p466_p2), %s355_s18, 4294966784  ;;  %s19_s17 = sadd.s32 1, %s638_s17   ;;  %s870_s12 = smov %s622_s13 }
 0x134   : > { %p16_p5 = scmp.ge.s32.totalorder %s19_s17, 4   ;;  %s871_s13 = smov %s626_s14 }
 0x135   : > { %s872_s14 = smov %s724_s26  ;;  %s873_s15 = smov %s634_s16 }
 0x136   : > { %s874_s16 = smov %s876_s20  ;;  %18 = sbr.rel (!%p16_p5) target bundleno = 6 (0x6), region = 77 }
 0x13d   :  { %360 = vsyncpa [#allocation3], 1 }
 0x13e   :  { %362 = vsyncpa [#allocation3 + $0x1], 1 }
 0x13f   :  { %363 = vsyncpa [#allocation4], 1 }
 0x140   :  { %365 = vsyncpa [#allocation4 + $0x1], 1 }

</bundles_post_ra>
